<compile_context>
chip_gen: v7x
topology: tpu7x:2x2x1
jax: 0.10.0
libtpu: 0.0.40
codegen_flags: <defaults>
</compile_context>

<pallas_src>
import functools

import jax
import jax.numpy as jnp
from jax import lax
from jax.experimental import pallas as pl
from jax.experimental.pallas import tpu as pltpu


# ----------------------------- small helpers ---------------------------------

def _round_up(x, m):
    return ((x + m - 1) // m) * m


def _vmem_limit(est_bytes):
    """Clamp a VMEM budget to the running chip's capacity, leaving ~20% headroom."""
    try:
        cap = int(pltpu.get_tpu_info().vmem_capacity_bytes)
    except Exception:                      # interpret mode / older jax: assume 128 MiB
        cap = 128 << 20
    hi = int(cap * 0.8)                    # ~51 MiB on v7x (64 MiB), ~102 MiB on v5e/v6e
    return int(min(max(est_bytes, 32 << 20), hi))


# ----------------------------- in-kernel math ---------------------------------

def _layernorm(x, g, b, eps=1e-5):
    mu = jnp.mean(x, axis=-1, keepdims=True)
    var = jnp.mean((x - mu) ** 2, axis=-1, keepdims=True)
    return (x - mu) * lax.rsqrt(var + eps) * g + b


def _erf(x):
    # Abramowitz & Stegun 7.1.26 polynomial (max abs error ~1.5e-7).  Uses only
    # exp / mul / add / where, so it always lowers in Mosaic; matches the exact
    # erf-based torch.nn.GELU to float32 working precision.
    a1, a2, a3, a4, a5 = 0.254829592, -0.284496736, 1.421413741, -1.453152027, 1.061405429
    p = 0.3275911
    ax = jnp.abs(x)
    t = 1.0 / (1.0 + p * ax)
    poly = ((((a5 * t + a4) * t + a3) * t + a2) * t + a1) * t
    y = 1.0 - poly * jnp.exp(-ax * ax)
    return jnp.where(x >= 0.0, y, -y)


def _gelu(x):
    return 0.5 * x * (1.0 + _erf(x * 0.7071067811865476))


# --------------------------------- kernels -----------------------------------

def patch_embed_kernel(p_ref, w_ref, b_ref, o_ref):
    # p_ref: (tm, K) bf16 patches; w_ref: (K, D) bf16; b_ref: (1, D) f32; o_ref: (tm, D) bf16
    o_ref[...] = (jnp.dot(p_ref[...], w_ref[...], preferred_element_type=jnp.float32)
                  + b_ref[...]).astype(o_ref.dtype)


def block_kernel(x_ref, ln1w_ref, ln1b_ref, wqkv_ref, wproj_ref, bproj_ref,
                 ln2w_ref, ln2b_ref, wfc1_ref, bfc1_ref, wfc2_ref, bfc2_ref,
                 o_ref, *, num_heads):
    # One full pre-LN transformer block for a single batch element.
    # Residual stream / LayerNorm / softmax math in f32; MXU operands bf16.
    # The 1/sqrt(hd) query scale is pre-folded into the Q columns of wqkv (wrapper).
    # TODO(synk): for production sizes (N ~ 3K, D >= 384) convert the attention
    #             branch to a flash-style online-softmax loop over KV tiles with
    #             (batch, head, q-tile) "parallel" grid axes and an "arbitrary" KV
    #             axis (KV tile >= 256 on v6e/v7x, 128 on v5e), pad N to a multiple
    #             of 128, and single-buffer the weight BlockSpecs (pl.Buffered(1))
    #             so the working set fits v7x's 64 MiB VMEM and both v7x
    #             TensorCores get work.
    x = x_ref[0].astype(jnp.float32)                                       # (N, D) f32
    n, d = x.shape
    hd = d // num_heads

    # --- multi-head self-attention branch ---
    xn = _layernorm(x, ln1w_ref[...], ln1b_ref[...])
    qkv = jnp.dot(xn.astype(jnp.bfloat16), wqkv_ref[...],
                  preferred_element_type=jnp.float32)                      # (N, 3D) f32
    q = qkv[:, 0 * d:1 * d].astype(jnp.bfloat16)                           # scale folded in
    k = qkv[:, 1 * d:2 * d].astype(jnp.bfloat16)
    v = qkv[:, 2 * d:3 * d].astype(jnp.bfloat16)

    # Fold W_proj into the head loop: softmax(qk^T)v @ Wproj == sum_h head_h @ Wproj[h].
    # TODO(synk): at production head counts switch this static unroll to a
    #             lax.fori_loop / head grid axis over a VMEM accumulator to bound
    #             per-head live ranges.
    attn_out = jnp.zeros((n, d), jnp.float32) + bproj_ref[...]
    nt_dims = (((1,), (1,)), ((), ()))                                      # q @ k^T
    for h in range(num_heads):
        sl = slice(h * hd, (h + 1) * hd)
        s = lax.dot_general(q[:, sl], k[:, sl], nt_dims,
                            preferred_element_type=jnp.float32)             # (N, N) f32
        s = s - jnp.max(s, axis=-1, keepdims=True)
        p = jnp.exp(s)                                                       # unnormalized
        l = jnp.sum(p, axis=-1, keepdims=True)                               # (N, 1)
        head = jnp.dot(p.astype(jnp.bfloat16), v[:, sl],
                       preferred_element_type=jnp.float32)                   # (N, hd)
        # Deferred softmax normalization: scale the (N, hd) head output instead of
        # the (N, N) probability matrix (~N/hd fewer VALU ops on this step).
        head = head * pl.reciprocal(l, approx=True)
        attn_out = attn_out + jnp.dot(head.astype(jnp.bfloat16), wproj_ref[sl, :],
                                      preferred_element_type=jnp.float32)    # (N, D)
    x = x + attn_out

    # --- MLP branch ---
    xn2 = _layernorm(x, ln2w_ref[...], ln2b_ref[...])
    h1 = jnp.dot(xn2.astype(jnp.bfloat16), wfc1_ref[...],
                 preferred_element_type=jnp.float32) + bfc1_ref[...]
    h1 = _gelu(h1)
    h2 = jnp.dot(h1.astype(jnp.bfloat16), wfc2_ref[...],
                 preferred_element_type=jnp.float32) + bfc2_ref[...]
    x = x + h2

    o_ref[0] = x.astype(o_ref.dtype)     # bf16 residual stream between blocks


def peg_kernel(x_ref, col_ref, w_ref, b_ref, o_ref, *, ph, pw):
    # Fused PEG: 3x3 depthwise conv (zero padding=1) + residual on patch tokens,
    # cls token (row 0) passes through unchanged.  Neighbor rows are produced with
    # pltpu.roll (XLU slot) over the flat token axis instead of pad/concat/slice
    # copies; the conv's zero padding is realized with row/column validity masks.
    #   x_ref: (1, N, D) bf16     col_ref: (N, 1) int32 column index (cls row = -1)
    #   w_ref: (9, D) f32 taps    b_ref:  (1, D) f32 bias
    x = x_ref[0].astype(jnp.float32)                         # (N, D), N = 1 + ph*pw
    n = x.shape[0]
    npat = ph * pw
    col = col_ref[...]                                       # (N, 1) int32
    row = lax.broadcasted_iota(jnp.int32, (n, 1), 0)         # token index i (patch p = i-1)
    w = w_ref[...]                                           # (9, D) f32

    acc = x + b_ref[...]                                     # residual + conv bias
    for dh in (-1, 0, 1):
        for dw in (-1, 0, 1):
            off = dh * pw + dw
            shifted = pltpu.roll(x, (-off) % n, 0) if off != 0 else x   # x[(i+off) mod N]
            # Given the column is valid, flat-index validity <=> row validity of the
            # 2D neighbor (r+dh, c+dw); out-of-range taps contribute zero (conv pad).
            flat_ok = ((row + off) >= 1) & ((row + off) <= npat)
            col_ok = ((col + dw) >= 0) & ((col + dw) < pw)
            ki = (dh + 1) * 3 + (dw + 1)
            tap = w[ki:ki + 1, :]                                        # (1, D)
            acc = acc + jnp.where(flat_ok & col_ok, shifted, 0.0) * tap
    # cls row passes through; no concatenate needed.
    o_ref[0] = jnp.where(row < 1, x, acc).astype(o_ref.dtype)


# ------------------------------ wrapper layers --------------------------------

def patch_embed(x_nchw, w_conv, b_conv, patch_size):
    # conv(kernel=stride=patch) == patch extraction + one big GEMM over all images.
    b, c, hh, ww = x_nchw.shape
    ph, pw = hh // patch_size, ww // patch_size
    d = w_conv.shape[0]
    npat = ph * pw
    k = c * patch_size * patch_size

    p = x_nchw.reshape(b, c, ph, patch_size, pw, patch_size)
    p = p.transpose(0, 2, 4, 1, 3, 5).reshape(b * npat, k).astype(jnp.bfloat16)

    m = b * npat
    if m >= 512:
        tm = 512          # ~85% of HBM roofline vs ~63% at 256-row tiles
    elif m >= 256:
        tm = 256
    else:
        tm = _round_up(m, 8)
    m_pad = _round_up(m, tm)
    if m_pad > m:
        p = jnp.pad(p, ((0, m_pad - m), (0, 0)))

    wmat = w_conv.reshape(d, k).T.astype(jnp.bfloat16)   # (K, D)
    bmat = b_conv.reshape(1, d).astype(jnp.float32)

    est = 2 * 2 * (tm * k + k * d + tm * d) + (2 << 20)
    out = pl.pallas_call(
        patch_embed_kernel,
        out_shape=jax.ShapeDtypeStruct((m_pad, d), jnp.bfloat16),
        grid=(m_pad // tm,),
        in_specs=[pl.BlockSpec((tm, k), lambda i: (i, 0)),
                  pl.BlockSpec((k, d), lambda i: (0, 0)),
                  pl.BlockSpec((1, d), lambda i: (0, 0))],
        out_specs=pl.BlockSpec((tm, d), lambda i: (i, 0)),
        compiler_params=pltpu.CompilerParams(
            dimension_semantics=("parallel",),
            vmem_limit_bytes=_vmem_limit(est)),
    )(p, wmat, bmat)
    tokens = out[:m].reshape(b, npat, d)
    return tokens, ph, pw


def transformer_block(x, prm, num_heads):
    b, n, d = x.shape
    h = prm["w_fc1"].shape[1]
    assert d % num_heads == 0 and (d // num_heads) % 8 == 0, \
        "head dim must be a multiple of 8 (sublane alignment)"
    hd = d // num_heads

    # Fold the 1/sqrt(hd) attention scale into the Q columns of w_qkv once at
    # wrapper time (zero-cost weight transform).
    w_qkv = prm["w_qkv"]
    w_qkv = jnp.concatenate(
        [(w_qkv[:, :d].astype(jnp.float32) * (hd ** -0.5)).astype(w_qkv.dtype),
         w_qkv[:, d:]], axis=1)

    kern = functools.partial(block_kernel, num_heads=num_heads)

    def full(shape):
        nd = len(shape)
        return pl.BlockSpec(shape, lambda i, _nd=nd: (0,) * _nd)
    # TODO(synk): single-buffer these constant-index weight specs
    #             (pipeline_mode=pl.Buffered(1)) once the flash rewrite lands;
    #             at toy sizes the duplication is negligible.

    # VMEM sizing: double-buffered bf16 token blocks + (double-buffered) bf16
    # weights + in-kernel f32 activations, x1.5 margin; clamped to chip capacity.
    bytes_io = 2 * 2 * (2 * n * d)                              # bf16 in + out
    bytes_w = 2 * 2 * (d * 3 * d + d * d + d * h + h * d)       # bf16 weights
    bytes_act = 4 * (n * 3 * d + 4 * n * d + n * h + 2 * n * n)
    est = (3 * (bytes_io + bytes_w + bytes_act)) // 2 + (4 << 20)

    in_specs = [pl.BlockSpec((1, n, d), lambda i: (i, 0, 0)),
                full((1, d)), full((1, d)),
                full((d, 3 * d)),
                full((d, d)), full((1, d)),
                full((1, d)), full((1, d)),
                full((d, h)), full((1, h)),
                full((h, d)), full((1, d))]
    return pl.pallas_call(
        kern,
        out_shape=jax.ShapeDtypeStruct((b, n, d), jnp.bfloat16),
        grid=(b,),
        in_specs=in_specs,
        out_specs=pl.BlockSpec((1, n, d), lambda i: (i, 0, 0)),
        compiler_params=pltpu.CompilerParams(
            dimension_semantics=("parallel",),
            vmem_limit_bytes=_vmem_limit(est)),
    )(x, prm["ln1_w"], prm["ln1_b"], w_qkv,
      prm["w_proj"], prm["b_proj"], prm["ln2_w"], prm["ln2_b"],
      prm["w_fc1"], prm["b_fc1"], prm["w_fc2"], prm["b_fc2"])


def peg(x, w_dw, b_dw, ph, pw):
    # x: (B, 1 + Ph*Pw, D) bf16; cls token passes through unchanged (in-kernel).
    b, n, d = x.shape
    w9 = w_dw.reshape(d, 9).T.astype(jnp.float32)        # row k = kernel tap (k//3, k%3)
    b1 = b_dw.reshape(1, d).astype(jnp.float32)
    # Column index of each token's patch, precomputed on host (avoids in-kernel
    # integer div/mod on vectors); cls row gets -1 and is masked in-kernel anyway.
    pidx = jnp.arange(n, dtype=jnp.int32) - 1
    col = jnp.where(pidx >= 0, pidx % pw, -1).reshape(n, 1).astype(jnp.int32)

    kern = functools.partial(peg_kernel, ph=ph, pw=pw)
    est = (2 * 2 * (2 * n * d)          # bf16 in + out, double-buffered
           + 16 * 4 * n * d             # in-kernel f32 temporaries (x, acc, rolled copies)
           + (2 << 20))
    return pl.pallas_call(
        kern,
        out_shape=jax.ShapeDtypeStruct((b, n, d), jnp.bfloat16),
        grid=(b,),
        in_specs=[pl.BlockSpec((1, n, d), lambda i: (i, 0, 0)),
                  pl.BlockSpec((n, 1), lambda i: (0, 0)),
                  pl.BlockSpec((9, d), lambda i: (0, 0)),
                  pl.BlockSpec((1, d), lambda i: (0, 0))],
        out_specs=pl.BlockSpec((1, n, d), lambda i: (i, 0, 0)),
        compiler_params=pltpu.CompilerParams(
            dimension_semantics=("parallel",),
            vmem_limit_bytes=_vmem_limit(est)),
    )(x, col, w9, b1)


def cpvt_forward(x_nchw, params, *, patch_size, num_heads, pool="cls"):
    b = x_nchw.shape[0]
    tokens, ph, pw = patch_embed(x_nchw, params["patch_w"], params["patch_b"], patch_size)
    d = tokens.shape[-1]
    cls = jnp.broadcast_to(params["cls_token"].astype(tokens.dtype), (b, 1, d))
    x = jnp.concatenate([cls, tokens], axis=1)           # (B, 1+Np, D) bf16 residual stream
    # TODO(synk): for production configs pad N = 1 + Ph*Pw up to a multiple of 128
    #             (mask pad rows in softmax) so scores / stores stay lane-dense.
    for i, bp in enumerate(params["blocks"]):
        x = transformer_block(x, bp, num_heads)
        if i == 0:
            x = peg(x, params["peg_w"], params["peg_b"], ph, pw)
    # reference forward_feature never applies self.norm -> skip it here too.
    if pool == "mean":
        x = x.mean(axis=1)
    elif pool == "cls":
        x = x[:, 0]
    else:
        raise ValueError('pool must be "mean" or "cls"')
    # classification=False (default) -> no head.
    return x.astype(jnp.float32)


# ------------------------------ parameter init --------------------------------

def init_params(key, *, in_chans, embed_dim, patch_size, depth, mlp_ratio):
    d = embed_dim
    hidden = int(d * mlp_ratio)
    keys = jax.random.split(key, 2 + depth)

    def tn(k, shape, std=0.02, dtype=jnp.float32):
        return (std * jax.random.truncated_normal(k, -2.0, 2.0, shape)).astype(dtype)

    params = {
        # Matmul weights stored in bf16 (f32 accumulation happens on the MXU).
        "patch_w": tn(keys[0], (d, in_chans, patch_size, patch_size), dtype=jnp.bfloat16),
        "patch_b": jnp.zeros((d,), jnp.float32),
        "cls_token": jnp.zeros((1, 1, d), jnp.float32),      # zeros, as in the module
        "peg_w": tn(keys[1], (d, 1, 3, 3)),                   # depthwise 3x3 (groups=d), VPU f32
        "peg_b": jnp.zeros((d,), jnp.float32),
        "blocks": [],
    }
    for i in range(depth):
        ks = jax.random.split(keys[2 + i], 4)
        params["blocks"].append({
            "ln1_w": jnp.ones((1, d), jnp.float32), "ln1_b": jnp.zeros((1, d), jnp.float32),
            "w_qkv": tn(ks[0], (d, 3 * d), dtype=jnp.bfloat16),     # qkv_bias=False (default)
            "w_proj": tn(ks[1], (d, d), dtype=jnp.bfloat16),
            "b_proj": jnp.zeros((1, d), jnp.float32),
            "ln2_w": jnp.ones((1, d), jnp.float32), "ln2_b": jnp.zeros((1, d), jnp.float32),
            "w_fc1": tn(ks[2], (d, hidden), dtype=jnp.bfloat16),
            "b_fc1": jnp.zeros((1, hidden), jnp.float32),
            "w_fc2": tn(ks[3], (hidden, d), dtype=jnp.bfloat16),
            "b_fc2": jnp.zeros((1, d), jnp.float32),
        })
    return params


# ----------------------------------- main --------------------------------------

if __name__ == "__main__":
    IMG, PATCH, CIN = 16, 4, 3
    EMBED, DEPTH, HEADS, MLP = 32, 2, 4, 4.0
    BATCH = 2

    key = jax.random.PRNGKey(0)
    kx, kp = jax.random.split(key)
    x = jax.random.normal(kx, (BATCH, CIN, IMG, IMG), jnp.float32)   # NCHW input
    params = init_params(kp, in_chans=CIN, embed_dim=EMBED, patch_size=PATCH,
                         depth=DEPTH, mlp_ratio=MLP)

    out = cpvt_forward(x, params, patch_size=PATCH, num_heads=HEADS, pool="cls")
    out = jax.block_until_ready(out)
    assert out.shape == (BATCH, EMBED), out.shape
    assert bool(jnp.all(jnp.isfinite(out)))
    print("KERNEL_OK")
</pallas_src>

<mosaic_0001>
module attributes {stable_mosaic.version = 11 : i64} {
  func.func @patch_embed_kernel(%arg0: i32, %arg1: memref<32x48xbf16, #tpu.memory_space<vmem>>, %arg2: memref<48x32xbf16, #tpu.memory_space<vmem>>, %arg3: memref<1x32xf32, #tpu.memory_space<vmem>>, %arg4: memref<32x32xbf16, #tpu.memory_space<vmem>>) attributes {dimension_semantics = [#tpu.dimension_semantics<parallel>], iteration_bounds = array<i64: 1>, scalar_prefetch = 0 : i64, scratch_operands = 0 : i64, tpu.core_type = #tpu.core_type<tc>, window_params = [{transform_indices = @transform_0, window_bounds = array<i64: 32, 48>}, {pipeline_mode = #tpu.pipeline_mode<synchronous>, transform_indices = @transform_1, window_bounds = array<i64: 48, 32>}, {pipeline_mode = #tpu.pipeline_mode<synchronous>, transform_indices = @transform_2, window_bounds = array<i64: 1, 32>}, {transform_indices = @transform_3, window_bounds = array<i64: 32, 32>}]} {
    %c0 = arith.constant 0 : index
    %c0_0 = arith.constant 0 : index
    %0 = vector.load %arg1[%c0, %c0_0] : memref<32x48xbf16, #tpu.memory_space<vmem>>, vector<32x48xbf16>
    %c0_1 = arith.constant 0 : index
    %c0_2 = arith.constant 0 : index
    %1 = vector.load %arg2[%c0_1, %c0_2] : memref<48x32xbf16, #tpu.memory_space<vmem>>, vector<48x32xbf16>
    %cst = arith.constant dense<0.000000e+00> : vector<32x32xf32>
    %2 = tpu.matmul %0, %1, %cst {dimension_numbers = #tpu.dot_dimension_numbers<[1], [0], [0], [1], [0, 0, 1, 1], [], []>} : vector<32x48xbf16>, vector<48x32xbf16>, vector<32x32xf32> -> vector<32x32xf32>
    %c0_3 = arith.constant 0 : index
    %c0_4 = arith.constant 0 : index
    %3 = vector.load %arg3[%c0_3, %c0_4] : memref<1x32xf32, #tpu.memory_space<vmem>>, vector<1x32xf32>
    %4 = vector.broadcast %3 : vector<1x32xf32> to vector<32x32xf32>
    %5 = arith.addf %2, %4 : vector<32x32xf32>
    %6 = arith.truncf %5 : vector<32x32xf32> to vector<32x32xbf16>
    %c0_5 = arith.constant 0 : index
    %c0_6 = arith.constant 0 : index
    %7 = vector.load %arg4[%c0_5, %c0_6] : memref<32x32xbf16, #tpu.memory_space<vmem>>, vector<32x32xbf16>
    tpu.vector_store %arg4[%c0_5, %c0_6], %6 {strides = array<i32>} : memref<32x32xbf16, #tpu.memory_space<vmem>>, vector<32x32xbf16>,
    return
  }
  func.func @transform_0(%arg0: i32) -> (i32, i32) {
    %c0_i32 = arith.constant 0 : i32
    %c0_i32_0 = arith.constant 0 : i32
    return %arg0, %c0_i32 : i32, i32
  }
  func.func @transform_1(%arg0: i32) -> (i32, i32) {
    %c0_i32 = arith.constant 0 : i32
    %c0_i32_0 = arith.constant 0 : i32
    %c0_i32_1 = arith.constant 0 : i32
    return %c0_i32, %c0_i32_0 : i32, i32
  }
  func.func @transform_2(%arg0: i32) -> (i32, i32) {
    %c0_i32 = arith.constant 0 : i32
    %c0_i32_0 = arith.constant 0 : i32
    %c0_i32_1 = arith.constant 0 : i32
    return %c0_i32, %c0_i32_0 : i32, i32
  }
  func.func @transform_3(%arg0: i32) -> (i32, i32) {
    %c0_i32 = arith.constant 0 : i32
    %c0_i32_0 = arith.constant 0 : i32
    return %arg0, %c0_i32 : i32, i32
  }
}

</mosaic_0001>

<bundles_post_ra>
// kernel: tpu_custom_call.1
= control target key start
LH: loop header
LB: loop body
LE: loop exit
PB: predicated region body
PF: predicated region fallthrough
CT: control target
= control target key end

     0   :  { %vm61_vm0 = vcmask 392192   ;;  %s274_s0 = inlined_call_operand.vmem [shape: bf16[32,48], index: 0, kind: input, shape index: {}]   ;;  %s275_s1 = inlined_call_operand.vmem [shape: bf16[48,32], index: 1, kind: input, shape index: {}]   ;;  %s276_s2 = inlined_call_operand.vmem [shape: f32[1,32], index: 2, kind: input, shape index: {}]   ;;  %s277_s3 = inlined_call_operand.hbm [shape: bf16[32,32], index: 3, kind: output, shape index: {}]  }
   0x1   :  { %v188_v0 = vld [vmem:[%s275_s1] sm:$0xff]   ;;  %v189_v1 = vld [vmem:[%s275_s1 + $0x8] sm:$0xff]   ;;  %v190_v3 = vld [vmem:[%s275_s1 + $0x10] sm:$0xff]  }
   0x2   :  { %175 = vmatprep.subr.bf16.mxu0 %v188_v0  ;;  %v191_v2 = vld [vmem:[%s274_s0] sm:$0xff]  }
   0x3   :  { %176 = vmatpush3.bf16.msra.mxu0 %v188_v0  ;;  %181 = vmatprep.mubr.msk.bf16.mxu0 %vm61_vm0, %v191_v2 }
   0x4   :  { %177 = vmatprep.subr.bf16.mxu0 %v189_v1 }
   0x5   :  { %8 = vsyncpa [#allocation3], 0  ;;  %v192_v4 = vld [vmem:[%s274_s0 + $0x8] sm:$0xff]   ;;  %v154_v5 = vld [vmem:[%s276_s2] ss:$0 sm:$0xff]  ;;  %vm133_vm1 = vcmask 257024  }
   0x6   :  { %s217_s1 = smov [#allocation2]  }
   0x7   :  { %178 = vmatpush3.bf16.msra.mxu0 %v189_v1  ;;  %s143_s24 = sshll.u32 %s217_s1, 4  ;;  %s144_s24 = int_to_ptr.vmem [resolvable:$true] %s143_s24 }
   0x8   :  { %179 = vmatprep.subr.bf16.mxu0 %v190_v3  ;;  %s193_s0 = scalar_lea.vmem %s144_s24, 256  ;;  %p198_p1 = scmp.lt.s32.totalorder %s144_s24, %s144_s24 }
   0x9   :  { %p194_p0 = scmp.ne.s32.totalorder %s144_s24, %s193_s0  ;;  %p199_p2 = scmp.lt.s32.totalorder %s193_s0, %s193_s0 }
   0xb   :  { %180 = vmatpush3.bf16.msra.mxu0 %v190_v3  ;;  %p200_p3 = por %p199_p2, %p198_p1 }
   0xd   :  { %p201_p4 = pnand %p200_p3, %p194_p0 }
   0xe   :  { %182 = vmatmul.mubr.msk.bf16.vlgmr.msra.gmra.mrb[0].mxu0 %vm61_vm0, %v192_v4 }
  0xe1   :  { %v183_v6 = vpop.f32.mrb[0].mxu0 }
  0xe2   :  { %v111_v7 = vadd.f32 %v183_v6, %v154_v5  ;;  %v102_v8 = vpop.f32.mrb[1].mxu0 }
  0xe3   :  { %v103_v9 = vadd.f32 %v154_v5, %v102_v8  ;;  %v184_v10 = vpop.f32.mrb[2].mxu0 }
  0xe4   :  { %v168_v11 = vpack.c.bf16 %v111_v7, %v111_v7  ;;  %v114_v12 = vadd.f32 %v184_v10, %v154_v5  ;;  %v105_v13 = vpop.f32.mrb[3].mxu0 }
  0xe5   :  { %v166_v14 = vpack.c.bf16 %v103_v9, %v103_v9  ;;  %v106_v15 = vadd.f32 %v154_v5, %v105_v13 }
  0xe6   :  { %136 = vst.msk [vmem:[#allocation2 + $0x8] sm:$0xf] %vm133_vm1, %v168_v11  ;;  %v169_v16 = vpack.c.bf16 %v114_v12, %v114_v12 }
  0xe7   :  { %134 = vst.msk [vmem:[#allocation2] sm:$0xf] %vm133_vm1, %v166_v14  ;;  %v167_v17 = vpack.c.bf16 %v106_v15, %v106_v15 }
  0xe8   :  { %137 = vst.msk [vmem:[#allocation2 + $0xc] sm:$0xf] %vm133_vm1, %v169_v16 }
  0xe9   :  { %135 = vst.msk [vmem:[#allocation2 + $0x4] sm:$0xf] %vm133_vm1, %v167_v17 }
  0xea   :  { %204 = shalt.err (!%p201_p4)
}
  0xeb   :  { %s205_s26 = scalar_lea.hbm %s277_s3, 256 }
  0xec   :  { %p206_p5 = scmp.ne.s32.totalorder %s277_s3, %s205_s26  ;;  %p209_p6 = scmp.lt.u32.totalorder %s205_s26, %s277_s3 }
  0xee   :  { %p211_p7 = pnand %p209_p6, %p206_p5 }
  0xf0   :  { %214 = shalt.err (!%p211_p7)
}
  0xf1   :  { %s218_s4 = smov 64   ;;  %s219_s5 = smov 4  }
  0xf2   :  { %149 = dma.vmem_to_hbm [thread:$0]  %s144_s24, 256, %s277_s3, [#allocation3], %s218_s4, %s218_s4, %s219_s5  }
  0xf3   :  { %215 = dma.done.wait [#allocation3], 256  }
  0xf4   :  { %216 = vsyncadd [#allocation3], 4294967040 }
  0xf5   :  { %153 = vsyncpa [#allocation3], 1 }

</bundles_post_ra>
